<compile_context>
chip_gen: v6e
topology: v6e:2x2x1
jax: 0.10.0
libtpu: 0.0.40
codegen_flags: <defaults>
</compile_context>

<pallas_src>
import math

import jax
import jax.numpy as jnp
from jax import lax
from jax.experimental import pallas as pl
from jax.experimental.pallas import tpu as pltpu


def _pick_head_block(n_head, head_dim):
    """Largest divisor of n_head such that head_block*head_dim ~ 128 lanes."""
    target = max(1, 128 // max(1, head_dim))
    for h in range(min(n_head, target), 0, -1):
        if n_head % h == 0:
            return h
    return 1


def _make_attention_kernel(h_blk, head_dim, use_bf16_mxu):
    scale = 1.0 / math.sqrt(head_dim)
    hbd = h_blk * head_dim
    mxu_dtype = jnp.bfloat16 if use_bf16_mxu else jnp.float32

    def kernel(x_ref, wqkv_ref, bqkv_ref, bias_ref, out_ref, attn_ref):
        # x_ref:    (seq, d_model)            resident across the head-block sweep
        # wqkv_ref: (d_model, 3*hbd)          fused [Q|K|V] weights for this head block
        # bqkv_ref: (1, 3*hbd)
        # bias_ref: (h_blk, seq, seq)
        # out_ref:  (seq, hbd)                lane-dense output slab
        # attn_ref: (h_blk, seq, seq)
        x = x_ref[...]
        w = wqkv_ref[...]

        # Single wide projection matmul for all heads of this block (bf16 MXU,
        # f32 accumulation), bias added in f32.
        qkv = jnp.dot(x.astype(mxu_dtype), w.astype(mxu_dtype),
                      preferred_element_type=jnp.float32) + bqkv_ref[...]

        q_all = qkv[:, :hbd]              # (seq, hbd)
        k_all = qkv[:, hbd:2 * hbd]
        v_all = qkv[:, 2 * hbd:]

        out_cols = []
        for h in range(h_blk):            # static unroll over heads in the block
            lo, hi = h * head_dim, (h + 1) * head_dim
            qh = q_all[:, lo:hi].astype(mxu_dtype)
            kh = k_all[:, lo:hi].astype(mxu_dtype)
            vh = v_all[:, lo:hi]

            # QK^T without materializing k.T (contract last dims).
            logits = lax.dot_general(
                qh, kh, dimension_numbers=(((1,), (1,)), ((), ())),
                preferred_element_type=jnp.float32) * scale + bias_ref[h]

            m = jnp.max(logits, axis=-1, keepdims=True)
            e = jnp.exp(logits - m)
            denom = jnp.sum(e, axis=-1, keepdims=True)
            attn = e / denom              # exact softmax (user-visible output)
            attn_ref[h] = attn

            out_cols.append(
                jnp.dot(attn.astype(mxu_dtype), vh.astype(mxu_dtype),
                        preferred_element_type=jnp.float32))

        # One lane-dense store of the whole head block's output.
        out_ref[...] = jnp.concatenate(out_cols, axis=-1)

    return kernel


def self_attention_with_bias(x, bias, params, *, n_head, use_bf16_mxu=True):
    """x: (bs, seq, d_model) f32; bias: (bs, n_head, seq, seq) f32.

    params: dict with 'wq','wk','wv' (d_model, d_model) in PyTorch Linear
    layout (out, in) and 'bq','bk','bv' (d_model,).
    Returns (output (bs, n_head, seq, head_dim), attn_weights (bs, n_head, seq, seq)).
    """
    bs, seq, d_model = x.shape
    head_dim = d_model // n_head
    h_blk = _pick_head_block(n_head, head_dim)
    n_hblk = n_head // h_blk
    hbd = h_blk * head_dim

    # --- Fused, head-block-grouped QKV weights/biases (wrapper-side) --------
    # PyTorch Linear: y = x @ W.T + b, W = (out, in). Head block g owns output
    # features [g*hbd, (g+1)*hbd). Column layout per block: [Q_blk | K_blk | V_blk].
    def per_block_w(w):   # (out, in) -> (n_hblk, d_model, hbd)
        return w.T.reshape(d_model, n_hblk, hbd).transpose(1, 0, 2)

    def per_block_b(b):   # (d_model,) -> (n_hblk, 1, hbd)
        return b.reshape(n_hblk, 1, hbd)

    wqkv = jnp.concatenate(
        [per_block_w(params["wq"]), per_block_w(params["wk"]), per_block_w(params["wv"])],
        axis=-1)                                  # (n_hblk, d_model, 3*hbd)
    bqkv = jnp.concatenate(
        [per_block_b(params["bq"]), per_block_b(params["bk"]), per_block_b(params["bv"])],
        axis=-1)                                  # (n_hblk, 1, 3*hbd)

    kernel = _make_attention_kernel(h_blk, head_dim, use_bf16_mxu)

    out_shape = (
        # Lane-dense per-head-block output slab; un-interleaved below.
        jax.ShapeDtypeStruct((bs, n_hblk, seq, hbd), jnp.float32),
        jax.ShapeDtypeStruct((bs, n_head, seq, seq), jnp.float32),
    )

    grid_spec = pltpu.PrefetchScalarGridSpec(
        num_scalar_prefetch=0,
        grid=(bs, n_hblk),
        in_specs=[
            # x: block index depends only on batch -> resident across head blocks.
            pl.BlockSpec((None, seq, d_model), lambda b, g: (b, 0, 0)),
            # Fused per-head-block QKV weights / biases.
            pl.BlockSpec((None, d_model, 3 * hbd), lambda b, g: (g, 0, 0)),
            pl.BlockSpec((None, 1, 3 * hbd), lambda b, g: (g, 0, 0)),
            # Per-(batch, head-block) bias tile.
            pl.BlockSpec((None, h_blk, seq, seq), lambda b, g: (b, g, 0, 0)),
        ],
        out_specs=[
            pl.BlockSpec((None, None, seq, hbd), lambda b, g: (b, g, 0, 0)),
            pl.BlockSpec((None, h_blk, seq, seq), lambda b, g: (b, g, 0, 0)),
        ],
    )

    # --- VMEM limit: per-step tiles (double-buffered) + live intermediates,
    # clamped to the actual chip's capacity (64 MiB/TC on v7x). ---------------
    bytes_f32 = 4
    block_bytes = 2 * bytes_f32 * (
        seq * d_model                       # x block
        + d_model * 3 * hbd + 3 * hbd       # fused weights + biases
        + h_blk * seq * seq                 # bias in-block
        + h_blk * seq * seq                 # attn out-block
        + seq * hbd)                        # output slab
    live_bytes = bytes_f32 * (seq * 3 * hbd + 6 * seq * seq + 2 * seq * hbd)
    try:
        vmem_cap = pltpu.get_tpu_info().vmem_capacity_bytes
    except Exception:
        vmem_cap = 64 * 2 ** 20
    vmem_limit = int(min(0.9 * vmem_cap,
                         max(16 * 2 ** 20, block_bytes + live_bytes)))

    out_flat, attn = pl.pallas_call(
        kernel,
        out_shape=out_shape,
        grid_spec=grid_spec,
        compiler_params=pltpu.CompilerParams(
            dimension_semantics=("parallel", "parallel"),
            vmem_limit_bytes=vmem_limit,
        ),
    )(x, wqkv, bqkv, bias)

    # (bs, n_hblk, seq, h_blk*head_dim) -> (bs, n_head, seq, head_dim): pure
    # layout plumbing (the kernel stored a lane-dense slab).
    out = out_flat.reshape(bs, n_hblk, seq, h_blk, head_dim)
    out = out.transpose(0, 1, 3, 2, 4).reshape(bs, n_head, seq, head_dim)
    return out, attn


def _reference(x, bias, params, *, n_head, mxu_dtype=None):
    """Pure-JAX reference mirroring the PyTorch forward.

    With mxu_dtype=None this is the exact f32 forward; with
    mxu_dtype=jnp.bfloat16 it mirrors the kernel's bf16 MXU operands
    (f32 accumulation) for a tight numerical check.
    """
    bs, seq, d_model = x.shape
    head_dim = d_model // n_head

    def cast(a):
        return a.astype(mxu_dtype) if mxu_dtype is not None else a

    def lin(w, b):
        return jnp.dot(cast(x), cast(w.T), preferred_element_type=jnp.float32) + b

    def split_heads(y):
        return y.reshape(bs, seq, n_head, head_dim).transpose(0, 2, 1, 3)

    q = split_heads(lin(params["wq"], params["bq"]))
    k = split_heads(lin(params["wk"], params["bk"]))
    v = split_heads(lin(params["wv"], params["bv"]))

    logits = jnp.einsum("bhqd,bhkd->bhqk", cast(q), cast(k),
                        preferred_element_type=jnp.float32) / math.sqrt(head_dim) + bias
    w = jax.nn.softmax(logits, axis=-1)
    out = jnp.einsum("bhqk,bhkd->bhqd", cast(w), cast(v),
                     preferred_element_type=jnp.float32)
    return out, w


if __name__ == "__main__":
    bs, seq, d_model, n_head = 2, 8, 32, 4
    head_dim = d_model // n_head

    key = jax.random.PRNGKey(0)
    kx, kb, kwq, kwk, kwv, kbq, kbk, kbv = jax.random.split(key, 8)

    x = jax.random.normal(kx, (bs, seq, d_model), dtype=jnp.float32)
    bias = jax.random.normal(kb, (bs, n_head, seq, seq), dtype=jnp.float32)

    # Deterministic param init mimicking torch.nn.Linear (uniform +-1/sqrt(fan_in)).
    bound = 1.0 / math.sqrt(d_model)
    params = {
        "wq": jax.random.uniform(kwq, (d_model, d_model), jnp.float32, -bound, bound),
        "wk": jax.random.uniform(kwk, (d_model, d_model), jnp.float32, -bound, bound),
        "wv": jax.random.uniform(kwv, (d_model, d_model), jnp.float32, -bound, bound),
        "bq": jax.random.uniform(kbq, (d_model,), jnp.float32, -bound, bound),
        "bk": jax.random.uniform(kbk, (d_model,), jnp.float32, -bound, bound),
        "bv": jax.random.uniform(kbv, (d_model,), jnp.float32, -bound, bound),
    }

    out, attn = self_attention_with_bias(x, bias, params, n_head=n_head)
    jax.block_until_ready((out, attn))

    assert out.shape == (bs, n_head, seq, head_dim)
    assert attn.shape == (bs, n_head, seq, seq)

    # Softmax normalization is exact now -> rows sum to 1 to f32 precision.
    assert jnp.allclose(jnp.sum(attn, axis=-1), 1.0, atol=1e-5)

    # Tight check against a reference that mirrors the kernel's bf16 MXU
    # operands (f32 accumulation).
    out_ref_b, attn_ref_b = _reference(x, bias, params, n_head=n_head,
                                       mxu_dtype=jnp.bfloat16)
    assert jnp.allclose(out, out_ref_b, atol=5e-3, rtol=5e-3)
    assert jnp.allclose(attn, attn_ref_b, atol=5e-3, rtol=5e-3)

    # Looser check against the exact f32 PyTorch-equivalent forward; the gap
    # is only bf16 rounding of the MXU operands.
    out_ref, attn_ref = _reference(x, bias, params, n_head=n_head)
    assert jnp.allclose(out, out_ref, atol=5e-2, rtol=5e-2)
    assert jnp.allclose(attn, attn_ref, atol=5e-2, rtol=5e-2)

    print("KERNEL_OK")
</pallas_src>

<mosaic_0001>
module attributes {stable_mosaic.version = 11 : i64} {
  func.func @kernel(%arg0: i32, %arg1: i32, %arg2: memref<1x8x32xf32, #tpu.memory_space<vmem>>, %arg3: memref<1x32x96xf32, #tpu.memory_space<vmem>>, %arg4: memref<1x1x96xf32, #tpu.memory_space<vmem>>, %arg5: memref<1x4x8x8xf32, #tpu.memory_space<vmem>>, %arg6: memref<1x1x8x32xf32, #tpu.memory_space<vmem>>, %arg7: memref<1x4x8x8xf32, #tpu.memory_space<vmem>>) attributes {dimension_semantics = [#tpu.dimension_semantics<parallel>, #tpu.dimension_semantics<parallel>], iteration_bounds = array<i64: 2, 1>, scalar_prefetch = 0 : i64, scratch_operands = 0 : i64, tpu.core_type = #tpu.core_type<tc>, window_params = [{transform_indices = @transform_0, window_bounds = array<i64: 1, 8, 32>}, {transform_indices = @transform_1, window_bounds = array<i64: 1, 32, 96>}, {transform_indices = @transform_2, window_bounds = array<i64: 1, 1, 96>}, {transform_indices = @transform_3, window_bounds = array<i64: 1, 4, 8, 8>}, {transform_indices = @transform_4, window_bounds = array<i64: 1, 1, 8, 32>}, {transform_indices = @transform_5, window_bounds = array<i64: 1, 4, 8, 8>}]} {
    %c0 = arith.constant 0 : index
    %c0_0 = arith.constant 0 : index
    %c0_1 = arith.constant 0 : index
    %0 = vector.load %arg2[%c0, %c0_0, %c0_1] : memref<1x8x32xf32, #tpu.memory_space<vmem>>, vector<1x8x32xf32>
    %1 = vector.shape_cast %0 : vector<1x8x32xf32> to vector<8x32xf32>
    %c0_2 = arith.constant 0 : index
    %c0_3 = arith.constant 0 : index
    %c0_4 = arith.constant 0 : index
    %2 = vector.load %arg3[%c0_2, %c0_3, %c0_4] : memref<1x32x96xf32, #tpu.memory_space<vmem>>, vector<1x32x96xf32>
    %3 = vector.shape_cast %2 : vector<1x32x96xf32> to vector<32x96xf32>
    %4 = arith.truncf %1 : vector<8x32xf32> to vector<8x32xbf16>
    %5 = arith.truncf %3 : vector<32x96xf32> to vector<32x96xbf16>
    %cst = arith.constant dense<0.000000e+00> : vector<8x96xf32>
    %6 = tpu.matmul %4, %5, %cst {dimension_numbers = #tpu.dot_dimension_numbers<[1], [0], [0], [1], [0, 0, 1, 1], [], []>} : vector<8x32xbf16>, vector<32x96xbf16>, vector<8x96xf32> -> vector<8x96xf32>
    %c0_5 = arith.constant 0 : index
    %c0_6 = arith.constant 0 : index
    %c0_7 = arith.constant 0 : index
    %7 = vector.load %arg4[%c0_5, %c0_6, %c0_7] : memref<1x1x96xf32, #tpu.memory_space<vmem>>, vector<1x1x96xf32>
    %8 = vector.shape_cast %7 : vector<1x1x96xf32> to vector<1x96xf32>
    %9 = vector.broadcast %8 : vector<1x96xf32> to vector<8x96xf32>
    %10 = arith.addf %6, %9 : vector<8x96xf32>
    %11 = vector.extract_strided_slice %10 {offsets = [0, 0], sizes = [8, 32], strides = [1, 1]} : vector<8x96xf32> to vector<8x32xf32>
    %12 = vector.extract_strided_slice %10 {offsets = [0, 32], sizes = [8, 32], strides = [1, 1]} : vector<8x96xf32> to vector<8x32xf32>
    %13 = vector.extract_strided_slice %10 {offsets = [0, 64], sizes = [8, 32], strides = [1, 1]} : vector<8x96xf32> to vector<8x32xf32>
    %14 = vector.extract_strided_slice %11 {offsets = [0, 0], sizes = [8, 8], strides = [1, 1]} : vector<8x32xf32> to vector<8x8xf32>
    %15 = arith.truncf %14 : vector<8x8xf32> to vector<8x8xbf16>
    %16 = vector.extract_strided_slice %12 {offsets = [0, 0], sizes = [8, 8], strides = [1, 1]} : vector<8x32xf32> to vector<8x8xf32>
    %17 = arith.truncf %16 : vector<8x8xf32> to vector<8x8xbf16>
    %18 = vector.extract_strided_slice %13 {offsets = [0, 0], sizes = [8, 8], strides = [1, 1]} : vector<8x32xf32> to vector<8x8xf32>
    %cst_8 = arith.constant dense<0.000000e+00> : vector<8x8xf32>
    %19 = tpu.matmul %15, %17, %cst_8 {dimension_numbers = #tpu.dot_dimension_numbers<[1], [1], [0], [0], [0, 0, 1, 0], [], []>} : vector<8x8xbf16>, vector<8x8xbf16>, vector<8x8xf32> -> vector<8x8xf32>
    %cst_9 = arith.constant 0.353553385 : f32
    %20 = vector.broadcast %cst_9 : f32 to vector<8x8xf32>
    %21 = arith.mulf %19, %20 : vector<8x8xf32>
    %c0_10 = arith.constant 0 : index
    %c0_11 = arith.constant 0 : index
    %c0_12 = arith.constant 0 : index
    %c0_13 = arith.constant 0 : index
    %22 = vector.load %arg5[%c0_10, %c0_11, %c0_12, %c0_13] : memref<1x4x8x8xf32, #tpu.memory_space<vmem>>, vector<1x1x8x8xf32>
    %23 = vector.shape_cast %22 : vector<1x1x8x8xf32> to vector<8x8xf32>
    %24 = arith.addf %21, %23 : vector<8x8xf32>
    %cst_14 = arith.constant dense<0xFF800000> : vector<8xf32>
    %25 = vector.multi_reduction <maximumf>, %24, %cst_14 [1] : vector<8x8xf32> to vector<8xf32>
    %26 = vector.shape_cast %25 : vector<8xf32> to vector<8x1xf32>
    %27 = vector.broadcast %26 : vector<8x1xf32> to vector<8x8xf32>
    %28 = arith.subf %24, %27 : vector<8x8xf32>
    %29 = math.exp %28 : vector<8x8xf32>
    %cst_15 = arith.constant dense<0.000000e+00> : vector<8xf32>
    %30 = vector.multi_reduction <add>, %29, %cst_15 [1] : vector<8x8xf32> to vector<8xf32>
    %31 = vector.shape_cast %30 : vector<8xf32> to vector<8x1xf32>
    %32 = vector.broadcast %31 : vector<8x1xf32> to vector<8x8xf32>
    %33 = arith.divf %29, %32 : vector<8x8xf32>
    %c0_16 = arith.constant 0 : index
    %c0_17 = arith.constant 0 : index
    %c0_18 = arith.constant 0 : index
    %c0_19 = arith.constant 0 : index
    %34 = vector.load %arg7[%c0_16, %c0_17, %c0_18, %c0_19] : memref<1x4x8x8xf32, #tpu.memory_space<vmem>>, vector<1x1x8x8xf32>
    %35 = vector.shape_cast %34 : vector<1x1x8x8xf32> to vector<8x8xf32>
    %36 = vector.shape_cast %33 : vector<8x8xf32> to vector<1x1x8x8xf32>
    tpu.vector_store %arg7[%c0_16, %c0_17, %c0_18, %c0_19], %36 {strides = array<i32>} : memref<1x4x8x8xf32, #tpu.memory_space<vmem>>, vector<1x1x8x8xf32>,
    %37 = arith.truncf %33 : vector<8x8xf32> to vector<8x8xbf16>
    %38 = arith.truncf %18 : vector<8x8xf32> to vector<8x8xbf16>
    %cst_20 = arith.constant dense<0.000000e+00> : vector<8x8xf32>
    %39 = tpu.matmul %37, %38, %cst_20 {dimension_numbers = #tpu.dot_dimension_numbers<[1], [0], [0], [1], [0, 0, 1, 1], [], []>} : vector<8x8xbf16>, vector<8x8xbf16>, vector<8x8xf32> -> vector<8x8xf32>
    %40 = vector.extract_strided_slice %11 {offsets = [0, 8], sizes = [8, 8], strides = [1, 1]} : vector<8x32xf32> to vector<8x8xf32>
    %41 = arith.truncf %40 : vector<8x8xf32> to vector<8x8xbf16>
    %42 = vector.extract_strided_slice %12 {offsets = [0, 8], sizes = [8, 8], strides = [1, 1]} : vector<8x32xf32> to vector<8x8xf32>
    %43 = arith.truncf %42 : vector<8x8xf32> to vector<8x8xbf16>
    %44 = vector.extract_strided_slice %13 {offsets = [0, 8], sizes = [8, 8], strides = [1, 1]} : vector<8x32xf32> to vector<8x8xf32>
    %cst_21 = arith.constant dense<0.000000e+00> : vector<8x8xf32>
    %45 = tpu.matmul %41, %43, %cst_21 {dimension_numbers = #tpu.dot_dimension_numbers<[1], [1], [0], [0], [0, 0, 1, 0], [], []>} : vector<8x8xbf16>, vector<8x8xbf16>, vector<8x8xf32> -> vector<8x8xf32>
    %cst_22 = arith.constant 0.353553385 : f32
    %46 = vector.broadcast %cst_22 : f32 to vector<8x8xf32>
    %47 = arith.mulf %45, %46 : vector<8x8xf32>
    %c0_23 = arith.constant 0 : index
    %c1 = arith.constant 1 : index
    %c0_24 = arith.constant 0 : index
    %c0_25 = arith.constant 0 : index
    %48 = vector.load %arg5[%c0_23, %c1, %c0_24, %c0_25] : memref<1x4x8x8xf32, #tpu.memory_space<vmem>>, vector<1x1x8x8xf32>
    %49 = vector.shape_cast %48 : vector<1x1x8x8xf32> to vector<8x8xf32>
    %50 = arith.addf %47, %49 : vector<8x8xf32>
    %cst_26 = arith.constant dense<0xFF800000> : vector<8xf32>
    %51 = vector.multi_reduction <maximumf>, %50, %cst_26 [1] : vector<8x8xf32> to vector<8xf32>
    %52 = vector.shape_cast %51 : vector<8xf32> to vector<8x1xf32>
    %53 = vector.broadcast %52 : vector<8x1xf32> to vector<8x8xf32>
    %54 = arith.subf %50, %53 : vector<8x8xf32>
    %55 = math.exp %54 : vector<8x8xf32>
    %cst_27 = arith.constant dense<0.000000e+00> : vector<8xf32>
    %56 = vector.multi_reduction <add>, %55, %cst_27 [1] : vector<8x8xf32> to vector<8xf32>
    %57 = vector.shape_cast %56 : vector<8xf32> to vector<8x1xf32>
    %58 = vector.broadcast %57 : vector<8x1xf32> to vector<8x8xf32>
    %59 = arith.divf %55, %58 : vector<8x8xf32>
    %c0_28 = arith.constant 0 : index
    %c1_29 = arith.constant 1 : index
    %c0_30 = arith.constant 0 : index
    %c0_31 = arith.constant 0 : index
    %60 = vector.load %arg7[%c0_28, %c1_29, %c0_30, %c0_31] : memref<1x4x8x8xf32, #tpu.memory_space<vmem>>, vector<1x1x8x8xf32>
    %61 = vector.shape_cast %60 : vector<1x1x8x8xf32> to vector<8x8xf32>
    %62 = vector.shape_cast %59 : vector<8x8xf32> to vector<1x1x8x8xf32>
    tpu.vector_store %arg7[%c0_28, %c1_29, %c0_30, %c0_31], %62 {strides = array<i32>} : memref<1x4x8x8xf32, #tpu.memory_space<vmem>>, vector<1x1x8x8xf32>,
    %63 = arith.truncf %59 : vector<8x8xf32> to vector<8x8xbf16>
    %64 = arith.truncf %44 : vector<8x8xf32> to vector<8x8xbf16>
    %cst_32 = arith.constant dense<0.000000e+00> : vector<8x8xf32>
    %65 = tpu.matmul %63, %64, %cst_32 {dimension_numbers = #tpu.dot_dimension_numbers<[1], [0], [0], [1], [0, 0, 1, 1], [], []>} : vector<8x8xbf16>, vector<8x8xbf16>, vector<8x8xf32> -> vector<8x8xf32>
    %66 = vector.extract_strided_slice %11 {offsets = [0, 16], sizes = [8, 8], strides = [1, 1]} : vector<8x32xf32> to vector<8x8xf32>
    %67 = arith.truncf %66 : vector<8x8xf32> to vector<8x8xbf16>
    %68 = vector.extract_strided_slice %12 {offsets = [0, 16], sizes = [8, 8], strides = [1, 1]} : vector<8x32xf32> to vector<8x8xf32>
    %69 = arith.truncf %68 : vector<8x8xf32> to vector<8x8xbf16>
    %70 = vector.extract_strided_slice %13 {offsets = [0, 16], sizes = [8, 8], strides = [1, 1]} : vector<8x32xf32> to vector<8x8xf32>
    %cst_33 = arith.constant dense<0.000000e+00> : vector<8x8xf32>
    %71 = tpu.matmul %67, %69, %cst_33 {dimension_numbers = #tpu.dot_dimension_numbers<[1], [1], [0], [0], [0, 0, 1, 0], [], []>} : vector<8x8xbf16>, vector<8x8xbf16>, vector<8x8xf32> -> vector<8x8xf32>
    %cst_34 = arith.constant 0.353553385 : f32
    %72 = vector.broadcast %cst_34 : f32 to vector<8x8xf32>
    %73 = arith.mulf %71, %72 : vector<8x8xf32>
    %c0_35 = arith.constant 0 : index
    %c2 = arith.constant 2 : index
    %c0_36 = arith.constant 0 : index
    %c0_37 = arith.constant 0 : index
    %74 = vector.load %arg5[%c0_35, %c2, %c0_36, %c0_37] : memref<1x4x8x8xf32, #tpu.memory_space<vmem>>, vector<1x1x8x8xf32>
    %75 = vector.shape_cast %74 : vector<1x1x8x8xf32> to vector<8x8xf32>
    %76 = arith.addf %73, %75 : vector<8x8xf32>
    %cst_38 = arith.constant dense<0xFF800000> : vector<8xf32>
    %77 = vector.multi_reduction <maximumf>, %76, %cst_38 [1] : vector<8x8xf32> to vector<8xf32>
    %78 = vector.shape_cast %77 : vector<8xf32> to vector<8x1xf32>
    %79 = vector.broadcast %78 : vector<8x1xf32> to vector<8x8xf32>
    %80 = arith.subf %76, %79 : vector<8x8xf32>
    %81 = math.exp %80 : vector<8x8xf32>
    %cst_39 = arith.constant dense<0.000000e+00> : vector<8xf32>
    %82 = vector.multi_reduction <add>, %81, %cst_39 [1] : vector<8x8xf32> to vector<8xf32>
    %83 = vector.shape_cast %82 : vector<8xf32> to vector<8x1xf32>
    %84 = vector.broadcast %83 : vector<8x1xf32> to vector<8x8xf32>
    %85 = arith.divf %81, %84 : vector<8x8xf32>
    %c0_40 = arith.constant 0 : index
    %c2_41 = arith.constant 2 : index
    %c0_42 = arith.constant 0 : index
    %c0_43 = arith.constant 0 : index
    %86 = vector.load %arg7[%c0_40, %c2_41, %c0_42, %c0_43] : memref<1x4x8x8xf32, #tpu.memory_space<vmem>>, vector<1x1x8x8xf32>
    %87 = vector.shape_cast %86 : vector<1x1x8x8xf32> to vector<8x8xf32>
    %88 = vector.shape_cast %85 : vector<8x8xf32> to vector<1x1x8x8xf32>
    tpu.vector_store %arg7[%c0_40, %c2_41, %c0_42, %c0_43], %88 {strides = array<i32>} : memref<1x4x8x8xf32, #tpu.memory_space<vmem>>, vector<1x1x8x8xf32>,
    %89 = arith.truncf %85 : vector<8x8xf32> to vector<8x8xbf16>
    %90 = arith.truncf %70 : vector<8x8xf32> to vector<8x8xbf16>
    %cst_44 = arith.constant dense<0.000000e+00> : vector<8x8xf32>
    %91 = tpu.matmul %89, %90, %cst_44 {dimension_numbers = #tpu.dot_dimension_numbers<[1], [0], [0], [1], [0, 0, 1, 1], [], []>} : vector<8x8xbf16>, vector<8x8xbf16>, vector<8x8xf32> -> vector<8x8xf32>
    %92 = vector.extract_strided_slice %11 {offsets = [0, 24], sizes = [8, 8], strides = [1, 1]} : vector<8x32xf32> to vector<8x8xf32>
    %93 = arith.truncf %92 : vector<8x8xf32> to vector<8x8xbf16>
    %94 = vector.extract_strided_slice %12 {offsets = [0, 24], sizes = [8, 8], strides = [1, 1]} : vector<8x32xf32> to vector<8x8xf32>
    %95 = arith.truncf %94 : vector<8x8xf32> to vector<8x8xbf16>
    %96 = vector.extract_strided_slice %13 {offsets = [0, 24], sizes = [8, 8], strides = [1, 1]} : vector<8x32xf32> to vector<8x8xf32>
    %cst_45 = arith.constant dense<0.000000e+00> : vector<8x8xf32>
    %97 = tpu.matmul %93, %95, %cst_45 {dimension_numbers = #tpu.dot_dimension_numbers<[1], [1], [0], [0], [0, 0, 1, 0], [], []>} : vector<8x8xbf16>, vector<8x8xbf16>, vector<8x8xf32> -> vector<8x8xf32>
    %cst_46 = arith.constant 0.353553385 : f32
    %98 = vector.broadcast %cst_46 : f32 to vector<8x8xf32>
    %99 = arith.mulf %97, %98 : vector<8x8xf32>
    %c0_47 = arith.constant 0 : index
    %c3 = arith.constant 3 : index
    %c0_48 = arith.constant 0 : index
    %c0_49 = arith.constant 0 : index
    %100 = vector.load %arg5[%c0_47, %c3, %c0_48, %c0_49] : memref<1x4x8x8xf32, #tpu.memory_space<vmem>>, vector<1x1x8x8xf32>
    %101 = vector.shape_cast %100 : vector<1x1x8x8xf32> to vector<8x8xf32>
    %102 = arith.addf %99, %101 : vector<8x8xf32>
    %cst_50 = arith.constant dense<0xFF800000> : vector<8xf32>
    %103 = vector.multi_reduction <maximumf>, %102, %cst_50 [1] : vector<8x8xf32> to vector<8xf32>
    %104 = vector.shape_cast %103 : vector<8xf32> to vector<8x1xf32>
    %105 = vector.broadcast %104 : vector<8x1xf32> to vector<8x8xf32>
    %106 = arith.subf %102, %105 : vector<8x8xf32>
    %107 = math.exp %106 : vector<8x8xf32>
    %cst_51 = arith.constant dense<0.000000e+00> : vector<8xf32>
    %108 = vector.multi_reduction <add>, %107, %cst_51 [1] : vector<8x8xf32> to vector<8xf32>
    %109 = vector.shape_cast %108 : vector<8xf32> to vector<8x1xf32>
    %110 = vector.broadcast %109 : vector<8x1xf32> to vector<8x8xf32>
    %111 = arith.divf %107, %110 : vector<8x8xf32>
    %c0_52 = arith.constant 0 : index
    %c3_53 = arith.constant 3 : index
    %c0_54 = arith.constant 0 : index
    %c0_55 = arith.constant 0 : index
    %112 = vector.load %arg7[%c0_52, %c3_53, %c0_54, %c0_55] : memref<1x4x8x8xf32, #tpu.memory_space<vmem>>, vector<1x1x8x8xf32>
    %113 = vector.shape_cast %112 : vector<1x1x8x8xf32> to vector<8x8xf32>
    %114 = vector.shape_cast %111 : vector<8x8xf32> to vector<1x1x8x8xf32>
    tpu.vector_store %arg7[%c0_52, %c3_53, %c0_54, %c0_55], %114 {strides = array<i32>} : memref<1x4x8x8xf32, #tpu.memory_space<vmem>>, vector<1x1x8x8xf32>,
    %115 = arith.truncf %111 : vector<8x8xf32> to vector<8x8xbf16>
    %116 = arith.truncf %96 : vector<8x8xf32> to vector<8x8xbf16>
    %cst_56 = arith.constant dense<0.000000e+00> : vector<8x8xf32>
    %117 = tpu.matmul %115, %116, %cst_56 {dimension_numbers = #tpu.dot_dimension_numbers<[1], [0], [0], [1], [0, 0, 1, 1], [], []>} : vector<8x8xbf16>, vector<8x8xbf16>, vector<8x8xf32> -> vector<8x8xf32>
    %118 = tpu.concatenate %39, %65, %91, %117 in 1 : vector<8x8xf32>, vector<8x8xf32>, vector<8x8xf32>, vector<8x8xf32> -> vector<8x32xf32>
    %c0_57 = arith.constant 0 : index
    %c0_58 = arith.constant 0 : index
    %c0_59 = arith.constant 0 : index
    %c0_60 = arith.constant 0 : index
    %119 = vector.load %arg6[%c0_57, %c0_58, %c0_59, %c0_60] : memref<1x1x8x32xf32, #tpu.memory_space<vmem>>, vector<1x1x8x32xf32>
    %120 = vector.shape_cast %119 : vector<1x1x8x32xf32> to vector<8x32xf32>
    %121 = vector.shape_cast %118 : vector<8x32xf32> to vector<1x1x8x32xf32>
    tpu.vector_store %arg6[%c0_57, %c0_58, %c0_59, %c0_60], %121 {strides = array<i32>} : memref<1x1x8x32xf32, #tpu.memory_space<vmem>>, vector<1x1x8x32xf32>,
    return
  }
  func.func @transform_0(%arg0: i32, %arg1: i32) -> (i32, i32, i32) {
    %c0_i32 = arith.constant 0 : i32
    %c0_i32_0 = arith.constant 0 : i32
    %c0_i32_1 = arith.constant 0 : i32
    return %arg0, %c0_i32, %c0_i32_0 : i32, i32, i32
  }
  func.func @transform_1(%arg0: i32, %arg1: i32) -> (i32, i32, i32) {
    %c0_i32 = arith.constant 0 : i32
    %c0_i32_0 = arith.constant 0 : i32
    %c0_i32_1 = arith.constant 0 : i32
    return %arg1, %c0_i32, %c0_i32_0 : i32, i32, i32
  }
  func.func @transform_2(%arg0: i32, %arg1: i32) -> (i32, i32, i32) {
    %c0_i32 = arith.constant 0 : i32
    %c0_i32_0 = arith.constant 0 : i32
    %c0_i32_1 = arith.constant 0 : i32
    return %arg1, %c0_i32, %c0_i32_0 : i32, i32, i32
  }
  func.func @transform_3(%arg0: i32, %arg1: i32) -> (i32, i32, i32, i32) {
    %c0_i32 = arith.constant 0 : i32
    %c0_i32_0 = arith.constant 0 : i32
    %c0_i32_1 = arith.constant 0 : i32
    return %arg0, %arg1, %c0_i32, %c0_i32_0 : i32, i32, i32, i32
  }
  func.func @transform_4(%arg0: i32, %arg1: i32) -> (i32, i32, i32, i32) {
    %c0_i32 = arith.constant 0 : i32
    %c0_i32_0 = arith.constant 0 : i32
    %c0_i32_1 = arith.constant 0 : i32
    return %arg0, %arg1, %c0_i32, %c0_i32_0 : i32, i32, i32, i32
  }
  func.func @transform_5(%arg0: i32, %arg1: i32) -> (i32, i32, i32, i32) {
    %c0_i32 = arith.constant 0 : i32
    %c0_i32_0 = arith.constant 0 : i32
    %c0_i32_1 = arith.constant 0 : i32
    return %arg0, %arg1, %c0_i32, %c0_i32_0 : i32, i32, i32, i32
  }
}

</mosaic_0001>

<bundles_post_ra>
// kernel: tpu_custom_call.1
= control target key start
LH: loop header
LB: loop body
LE: loop exit
PB: predicated region body
PF: predicated region fallthrough
CT: control target
= control target key end

     0   :  { %s1893_s0 = inlined_call_operand.hbm [shape: f32[2,8,32], index: 0, kind: input, shape index: {}]   ;;  %s1894_s1 = inlined_call_operand.hbm [shape: f32[1,32,96], index: 1, kind: input, shape index: {}]   ;;  %s1895_s2 = inlined_call_operand.vmem [shape: f32[1,1,96], index: 2, kind: input, shape index: {}]   ;;  %s1896_s3 = inlined_call_operand.hbm [shape: f32[2,4,8,8], index: 3, kind: input, shape index: {}]   ;;  %s1897_s4 = inlined_call_operand.hbm [shape: f32[2,1,8,32], index: 4, kind: output, shape index: {0}]   ;;  %s1898_s5 = inlined_call_operand.hbm [shape: f32[2,4,8,8], index: 5, kind: output, shape index: {1}]  }
   0x1   :  { %1901 = sst [smem:[#allocation16_spill]] %s1893_s0 }
   0x2   :  { %11 = vsyncpa [#allocation3], 0 }
   0x3   :  { %13 = vsyncpa [#allocation3 + $0x1], 0 }
   0x4   :  { %14 = vsyncpa [#allocation6], 0 }
   0x5   :  { %15 = vsyncpa [#allocation4], 0 }
   0x6   :  { %17 = vsyncpa [#allocation4 + $0x1], 0 }
   0x7   :  { %18 = vsyncpa [#allocation10], 0 }
   0x8   :  { %20 = vsyncpa [#allocation10 + $0x1], 0  ;;  %s1579_s18 = smov 0   ;;  %s1581_s19 = smov 0  }
   0x9   :  { %s1583_s20 = smov 0   ;;  %s1585_s21 = smov 0  }
   0xa   :  { %s1587_s22 = smov 0   ;;  %s1589_s23 = smov 0  }
   0xb LB: > { %s38_s24 = sadd.s32 1, %s1519_s22  ;;  %s45_s25 = sadd.s32 1, %s1511_s20  ;;  %s1523_s23 = sphi %s1589_s23, %s26_s23   ;;  %s1519_s22 = sphi %s1587_s22, %s1918_s22   ;;  %s1515_s21 = sphi %s1585_s21, %s1917_s21   ;;  %s1511_s20 = sphi %s1583_s20, %s1916_s20   ;;  %s1507_s19 = sphi %s1581_s19, %s1915_s19   ;;  %s1503_s18 = sphi %s1579_s18, %s1914_s18  }
   0xc   : > { %p40_p0 = scmp.ge.s32.totalorder %s38_s24, 2  ;;  %p52_p1 = scmp.ne.s32.totalorder %s1511_s20, %s1507_s19 }
   0xd   : > { %p53_p2 = scmp.eq.s32.totalorder %s1523_s23, 0  ;;  %p1236_p5 = scmp.lt.s32.totalorder %s1523_s23, 2 }
   0xe   : > { %s1920_s24 = smov (%p40_p0, %s38_s24), 0  ;;  %s240_s27 = sand.u32 1, %s1523_s23  }
   0xf   : > { %p54_p4 = por %p53_p2, %p52_p1  ;;  %s42_s26 = ssub.s32 %s1519_s22, %s1920_s24 }
  0x10   : > { %p43_p6 = scmp.eq.s32.totalorder %s42_s26, 0  ;;  %s242_s28 = sand.u32 1, %s1511_s20  }
  0x11   : > { %s1095_s29 = sshll.u32 %s1519_s22, 7  ;;  %s1094_s6 = sshll.u32 %s242_s28, 3 }
  0x12   : > { %s1627_s30 = scalar_select %p43_p6, %s1511_s20, %s45_s25  }
  0x13   : > { %s1902_s0 = sld [smem:[#allocation16_spill]]  ;;  %p1632_p7 = pnand %p1236_p5, %p54_p4 }
  0x14   : > { %s244_s11 = scalar_lea.vmem [#allocation2], %s1094_s6  ;;  %s1096_s13 = sshll.u32 %s242_s28, 5 }
  0x15   : > { %s251_s12 = sshll.u32 %s244_s11, 4  ;;  %s1636_s14 = scalar_lea.sflag [#allocation3], %s240_s27  ;;  %s252_s12 = int_to_ptr.vmem [resolvable:$true] %s251_s12 }
  0x16   : > { %p1325_p8 = pneg %p1632_p7  ;;  %s1336_s15 = scalar_lea.vmem %s252_s12, 128 }
  0x17   : > { %p1337_p9 = scmp.ne.s32.totalorder %s252_s12, %s1336_s15  ;;  %s1525_s16 = smov [#allocation2]  }
  0x18   : > { %s1341_s17 = sshll.u32 %s1525_s16, 4  ;;  %s1342_s17 = int_to_ptr.vmem [resolvable:$false] %s1341_s17 }
  0x19   : > { %s249_s9 = scalar_lea.hbm %s1902_s0, %s1095_s29  ;;  %p1339_p10 = pnand %p1337_p9, %p1325_p8 }
  0x1a   : > { %s1343_s25 = scalar_lea.vmem %s1342_s17, 256  ;;  %p1344_p12 = scmp.lt.s32.totalorder %s252_s12, %s1342_s17 }
  0x1b   : > { %p1340_p11 = pneg %p1339_p10  ;;  %p1345_p13 = scmp.lt.s32.totalorder %s1343_s25, %s1336_s15 }
  0x1d   : > { %p1346_p0 = por %p1345_p13, %p1344_p12 }
  0x1f   : > { %p1347_p2 = pnand %p1346_p0, %p1340_p11 }
  0x21   : > { %1350 = shalt.err (!%p1347_p2)
}
  0x22   : > { %1224 = dma.hbm_to_vmem [thread:$0]  (!%p1632_p7), %s249_s9, 128, %s252_s12, %s1636_s14  }
  0x23   : > { %s1128_s26 = sshll.u32 %s1519_s22, 9  ;;  %s262_s27 = scalar_lea.vmem [#allocation7], %s1096_s13 }
  0x24   : > { %s271_s28 = sshll.u32 %s262_s27, 4  ;;  %s1648_s29 = sadd.s32 4294967295, %s1523_s23   ;;  %s272_s28 = int_to_ptr.vmem [resolvable:$true] %s271_s28 }
  0x25   : > { %s1089_s6 = sadd.s32 4294967294, %s1523_s23   ;;  %p58_p4 = scmp.ne.s32.totalorder %s1507_s19, %s1503_s18 }
  0x26   : > { %p1899_p5 = scmp.eq.s32.totalorder %s1648_s29, 0  ;;  %p164_p6 = scmp.eq.s32.totalorder %s1648_s29, 1 }
  0x27   : > { %p170_p9 = scmp.eq.s32.totalorder %s1089_s6, 1  ;;  %p1090_p11 = scmp.ge.s32.totalorder %s1523_s23, 1 }
  0x28   : > { %p1657_p10 = por %p1899_p5, %p58_p4  ;;  %p1665_p12 = por %p164_p6, %p52_p1 }
  0x29   : > { %p1669_p13 = por %p170_p9, %p58_p4  ;;  %p205_p0 = scmp.lt.s32.totalorder %s1523_s23, 3 }
  0x2a   : > { %s1905_s8 = scalar_select %p1665_p12, 1, 0 }
  0x2b   : > { %s1906_s9 = scalar_select %p1669_p13, 1, 0 }
  0x2c   : > { %p1674_p2 = pnand %p1090_p11, %p205_p0  ;;  %s1526_s12 = smov [#allocation5]  }
  0x2d   : > { %s220_s13 = sshll.u32 %s1526_s12, 4  ;;  %s270_s17 = scalar_lea.hbm %s1896_s3, %s1128_s26  ;;  %s221_s13 = int_to_ptr.vmem [resolvable:$true] %s220_s13 }
  0x2e   : > { %p1217_p3 = pneg %p1674_p2  ;;  %s1364_s25 = scalar_lea.vmem %s272_s28, 512 }
  0x2f   : > { %p1365_p1 = scmp.ne.s32.totalorder %s272_s28, %s1364_s25  ;;  %s1527_s27 = smov [#allocation7]  }
  0x30   : > { %s1369_s6 = sshll.u32 %s1527_s27, 4  ;;  %s1370_s6 = int_to_ptr.vmem [resolvable:$false] %s1369_s6 }
  0x31   : > { %p1367_p4 = pnand %p1365_p1, %p1325_p8  ;;  %s1371_s0 = scalar_lea.vmem %s1370_s6, 1024 }
  0x32   : > { %p1372_p9 = scmp.lt.s32.totalorder %s272_s28, %s1370_s6  ;;  %p1373_p11 = scmp.lt.s32.totalorder %s1371_s0, %s1364_s25 }
  0x33   : > { %p1368_p6 = pneg %p1367_p4 }
  0x34   : > { %p1374_p0 = por %p1373_p11, %p1372_p9 }
  0x36   : > { %p1375_p5 = pnand %p1374_p0, %p1368_p6 }
  0x38   : > { %1378 = shalt.err (!%p1375_p5)
}
  0x39   : > { %s1528_s12 = smov 128   ;;  %s1529_s26 = smov 8  }
  0x3a   : > { %1227 = dma.hbm_to_vmem [thread:$0]  (!%p1632_p7), %s270_s17, 512, %s272_s28, %s1636_s14, %s1528_s12, %s1528_s12, %s1529_s26  }
  0x3b   : > { %p1908_p8 = scmp.eq.s32.totalorder %s1648_s29, 0  ;;  %s1390_s15 = scalar_lea.vmem %s221_s13, 512 }
  0x3c   : > { %p1391_p13 = scmp.ne.s32.totalorder %s221_s13, %s1390_s15  ;;  %p1398_p6 = scmp.lt.s32.totalorder %s221_s13, %s221_s13 }
  0x3d   : > { %p1218_p1 = pnand %p1217_p3, %p1908_p8  ;;  %p1399_p5 = scmp.lt.s32.totalorder %s1390_s15, %s1390_s15 }
  0x3f   : > { %p1381_p4 = pneg %p1218_p1  ;;  %p1400_p11 = por %p1399_p5, %p1398_p6 }
  0x41   : > { %p1393_p12 = pnand %p1391_p13, %p1381_p4 }
  0x43   : > { %p1394_p9 = pneg %p1393_p12 }
  0x45   : > { %p1401_p0 = pnand %p1400_p11, %p1394_p9 }
  0x47   : > { %1404 = shalt.err (!%p1401_p0)
}
  0x48   : > { %1220 = dma.hbm_to_vmem [thread:$0]  (!%p1218_p1), %s1894_s1, 512, %s221_s13, [#allocation6], %s1528_s12, %s1528_s12, %s1529_s26  }
  0x49   : > { %283 = sbr.rel (%p1674_p2) target bundleno = 1317 (0x525), region = 36  ;;  %s285_s10 = sand.u32 (!%p1674_p2), 1, %s1648_s29  }
  0x4a   : > { %s1701_s14 = sand.u32 (!%p1674_p2), 1, %s1507_s19   ;;  %s286_s17 = scalar_lea.sflag (!%p1674_p2), [#allocation3], %s285_s10 }
  0x4b   : > { %s1100_s28 = sshll.u32 (!%p1674_p2), %s1701_s14, 3 }
  0x4c   : > { %s289_s25 = scalar_lea.vmem (!%p1674_p2), [#allocation2], %s1100_s28 }
  0x4e   : > { %1482 = dma.done.wait (%p1657_p10), %s286_s17, 128  }
  0x4f   : > { %1484 = vsyncadd (%p1657_p10), %s286_s17, 4294967168  ;;  %p1909_p3 = scmp.eq.s32.totalorder %s1648_s29, 0 }
  0x51   : > { %1486 = dma.done.wait (%p1909_p3), [#allocation6], 512   ;;  %p1910_p7 = pmov %p1909_p3 }
  0x52   : > { %s1102_s11 = sshll.u32 %s1701_s14, 5 }
  0x53   : > { %1488 = vsyncadd (%p1910_p7), [#allocation6], 4294966784  ;;  %s1717_s13 = scalar_lea.vmem [#allocation7], %s1102_s11 }
  0x54   : > { %1490 = dma.done.wait (%p1657_p10), %s286_s17, 512  }
  0x55   : > { %1492 = vsyncadd (%p1657_p10), %s286_s17, 4294966784  ;;  %v1530_v0 = vmov 0.0   ;;  %vm1531_vm0 = vmmov 0   ;;  %v351_v1 = vld [vmem:[#allocation5 + $0x10] sm:$0xff]  ;;  %v352_v2 = vld [vmem:[#allocation5 + $0x18] sm:$0xff]  ;;  %vm363_vm1 = vcmask 261120  }
  0x56   : > { %1149 = vmatprep.subr.bf16.mxu0 %v1530_v0  ;;  %1153 = vmatprep.mubr.msk.bf16.mxu0 %vm1531_vm0, %v1530_v0  ;;  %v349_v3 = vld [vmem:[#allocation5] sm:$0xff]  ;;  %v355_v4 = vpack.c.bf16 %v352_v2, %v351_v1  ;;  %v350_v5 = vld [vmem:[#allocation5 + $0x8] sm:$0xff]  ;;  %v348_v7 = vld [vmem:[%s289_s25] sm:$0xff]  ;;  %s1532_s27 = smov 120   ;;  %s1533_s6 = smov 96   ;;  %vm411_vm2 = vcmask 64512  }
  0x57   : > { %1157 = vmatprep.subr.bf16.mxu1 %v1530_v0  ;;  %1159 = vmatprep.mubr.msk.bf16.mxu1 %vm1531_vm0, %v1530_v0  ;;  %v354_v6 = vpack.c.bf16 %v350_v5, %v349_v3  ;;  %v353_v8 = vpack.c.bf16 %v348_v7, %v348_v7  ;;  %v1105_v9 = vld [vmem:[%s1895_s2] ss:$0 sm:$0xff]  ;;  %s1534_s12 = smov 80   ;;  %s1535_s26 = smov 88   ;;  %v459_v28 = vld [vmem:[%s1717_s13] sm:$0xff]  ;;  %v1110_v36 = vld [vmem:[%s1717_s13 + $0x8] sm:$0xff] }
  0x58   : > { %1150 = vmatpush3.bf16.msra.mxu0 %v355_v4  ;;  %s1536_s15 = smov 72   ;;  %s1537_s0 = smov 112   ;;  %v1114_v44 = vld [vmem:[%s1717_s13 + $0x10] sm:$0xff]  ;;  %v1118_v52 = vld [vmem:[%s1717_s13 + $0x18] sm:$0xff]  ;;  %vm479_vm3 = vcmask 1043456  }
  0x59   : > { %1151 = vmatprep.subr.bf16.mxu0 %v1530_v0  ;;  %s1538_s16 = smov 104   ;;  %s1539_s10 = smov 56  }
  0x5a   : > { %s1540_s17 = smov 64   ;;  %s1541_s25 = smov 40  }
  0x5b   : > { %s1542_s13 = smov 48   ;;  %s1782_s29 = scalar_lea.vmem [#allocation9], %s1102_s11 }
  0x5c   : > { %1152 = vmatpush3.bf16.msra.mxu0 %v354_v6  ;;  %s1543_s11 = smov 8   ;;  %s1544_s7 = smov 16  }
  0x5d   : > { %1163 = vmatprep.subr.bf16.mxu0 %v1530_v0  ;;  %p1911_p12 = scmp.ne.s32.totalorder %s1905_s8, 0 }
  0x5f   : > { %1154 = vmatmul.mubr.msk.bf16.vlgmr.msra.gmra.mxu0 %vm363_vm1, %v353_v8 }
  0x60   : > { %1165 = vmatprep.mubr.msk.bf16.mxu0 %vm1531_vm0, %v1530_v0 }
 0x11f   : > { %v401_v10 = vpop.f32.mrf.mxu0 }
 0x120   : > { %v402_v11 = vadd.f32 %v1105_v9, %v401_v10 }
 0x121   : > { %v1155_v12 = vpop.f32.mrf.mxu0 }
 0x122   : > { %v1737_v13 = vpack.c.bf16 %v402_v11, %v402_v11 }
 0x123   : > { %v404_v14 = vpop.f32.mrf.mxu0 }
 0x124   : > { %523 = vrot.lane.b32.xlu1 %v1737_v13, %s1532_s27  ;;  %409 = vrot.lane.b32.xlu0 %v1737_v13, %s1533_s6  ;;  %s1129_s27 = sshll.u32 %s1515_s21, 9  ;;  %s924_s6 = sshll.u32 %s1782_s29, 4  ;;  %s1817_s6 = int_to_ptr.vmem [resolvable:$true] %s924_s6 }
 0x125   : > { %v1156_v15 = vpop.f32.mrf.mxu0 }
 0x128   : > { %641 = vrot.lane.b32.xlu1 %v1737_v13, %s1534_s12  ;;  %525 = vrot.lane.b32.xlu0 %v1737_v13, %s1535_s26 }
 0x12c   : > { %757 = vrot.lane.b32.xlu1 %v1737_v13, %s1536_s15  ;;  %639 = vrot.lane.b32.xlu0 %v1737_v13, %s1537_s0  ;;  %s1815_s15 = scalar_lea.hbm %s1898_s5, %s1129_s27  ;;  %s895_s0 = scalar_lea.sflag [#allocation10], %s1701_s14 }
 0x130   : > { %755 = vrot.lane.b32.xlu0 %v1737_v13, %s1538_s16  ;;  %s1405_s16 = scalar_lea.vmem %s1817_s6, 512 }
 0x131   : > { %p1406_p10 = scmp.ne.s32.totalorder %s1817_s6, %s1405_s16 }
 0x133   : > { %p1407_p13 = pnand %p1406_p10, %p1911_p12 }
 0x135   : > { %p1408_p2 = pneg %p1407_p13 }
 0x196   : > { %v410_v16 = vpop.permute.xlu0 %409  ;;  %v524_v19 = vpop.permute.xlu1 %523 }
 0x197   : > { %v416_v17 = vsel %vm411_vm2, %v410_v16, 0 }
 0x198   : > { %1158 = vmatpush3.bf16.xpose.msra.mxu1 %v416_v17 }
 0x199   : > { %1169 = vmatprep.subr.bf16.mxu1 %v1530_v0 }
 0x19a   : > { %v526_v18 = vpop.permute.xlu0 %525  ;;  %v642_v21 = vpop.permute.xlu1 %641 }
 0x19b   : > { %v531_v20 = vsel %vm411_vm2, %v526_v18, 0  ;;  %v647_v22 = vsel %vm411_vm2, %v642_v21, 0 }
 0x19e   : > { %v758_v23 = vpop.permute.xlu1 %757  ;;  %v640_v24 = vpop.permute.xlu0 %639 }
 0x19f   : > { %1160 = vmatmul.mubr.msk.bf16.vlgmr.msra.gmra.mxu1 %vm411_vm2, %v1737_v13  ;;  %v763_v25 = vsel %vm411_vm2, %v758_v23, 0 }
 0x1a0   : > { %1170 = vmatpush3.bf16.xpose.msra.mxu1 %v531_v20  ;;  %1171 = vmatprep.mubr.msk.bf16.mxu1 %vm1531_vm0, %v1530_v0 }
 0x1a1   : > { %1181 = vmatprep.subr.bf16.mxu1 %v1530_v0 }
 0x1a2   : > { %v756_v26 = vpop.permute.xlu0 %755 }
 0x1a7   : > { %1172 = vmatmul.mubr.msk.bf16.vlgmr.msra.gmra.mxu1 %vm411_vm2, %v524_v19 }
 0x1a8   : > { %1182 = vmatpush3.bf16.xpose.msra.mxu1 %v647_v22  ;;  %1183 = vmatprep.mubr.msk.bf16.mxu1 %vm1531_vm0, %v1530_v0 }
 0x1a9   : > { %1193 = vmatprep.subr.bf16.mxu1 %v1530_v0 }
 0x1af   : > { %1184 = vmatmul.mubr.msk.bf16.vlgmr.msra.gmra.mxu1 %vm411_vm2, %v640_v24 }
 0x1b0   : > { %1194 = vmatpush3.bf16.xpose.msra.mxu1 %v763_v25  ;;  %1195 = vmatprep.mubr.msk.bf16.mxu1 %vm1531_vm0, %v1530_v0 }
 0x1b7   : > { %1196 = vmatmul.mubr.msk.bf16.vlgmr.msra.gmra.mxu1 %vm411_vm2, %v756_v26 }
 0x25f   : > { %v452_v27 = vpop.f32.mrf.mxu1 }
 0x260   : > { %v458_v29 = vmul.f32 0.35355338, %v452_v27 }
 0x261   : > { %v1161_v30 = vpop.f32.mrf.mxu1 }
 0x262   : > { %v460_v31 = vadd.f32 %v459_v28, %v458_v29 }
 0x263   : > { %v455_v32 = vpop.f32.mrf.mxu1 }
 0x264   : > { %v461_v33 = vsel %vm411_vm2, %v460_v31, -inf }
 0x265   : > { %462 = vmax.xlane.f32.xlu1 %v461_v33  ;;  %v1162_v34 = vpop.f32.mrf.mxu1 }
 0x267   : > { %v567_v35 = vpop.f32.mrf.mxu1 }
 0x268   : > { %v573_v37 = vmul.f32 0.35355338, %v567_v35 }
 0x269   : > { %v1173_v38 = vpop.f32.mrf.mxu1 }
 0x26a   : > { %v576_v39 = vadd.f32 %v1110_v36, %v573_v37 }
 0x26b   : > { %v570_v40 = vpop.f32.mrf.mxu1 }
 0x26c   : > { %v577_v41 = vsel %vm411_vm2, %v576_v39, -inf }
 0x26d   : > { %578 = vmax.xlane.f32.xlu0 %v577_v41  ;;  %v1174_v42 = vpop.f32.mrf.mxu1 }
 0x26f   : > { %v683_v43 = vpop.f32.mrf.mxu1 }
 0x270   : > { %v689_v45 = vmul.f32 0.35355338, %v683_v43 }
 0x271   : > { %v1185_v46 = vpop.f32.mrf.mxu1 }
 0x272   : > { %v692_v47 = vadd.f32 %v1114_v44, %v689_v45 }
 0x273   : > { %v686_v48 = vpop.f32.mrf.mxu1 }
 0x274   : > { %v693_v49 = vsel %vm411_vm2, %v692_v47, -inf }
 0x275   : > { %694 = vmax.xlane.f32.xlu0 %v693_v49  ;;  %v1186_v50 = vpop.f32.mrf.mxu1 }
 0x277   : > { %v799_v51 = vpop.f32.mrf.mxu1 }
 0x278   : > { %v805_v53 = vmul.f32 0.35355338, %v799_v51 }
 0x279   : > { %v1197_v54 = vpop.f32.mrf.mxu1 }
 0x27a   : > { %v808_v55 = vadd.f32 %v1118_v52, %v805_v53 }
 0x27b   : > { %v802_v56 = vpop.f32.mrf.mxu1 }
 0x27c   : > { %v809_v57 = vsel %vm411_vm2, %v808_v55, -inf }
 0x27d   : > { %810 = vmax.xlane.f32.xlu1 %v809_v57  ;;  %v1198_v58 = vpop.f32.mrf.mxu1 }
 0x2ee   : > { %v463_v59 = vpop.xlane.xlu1 %462 }
 0x2ef   : > { %v464_v60 = vsub.f32 %v460_v31, %v463_v59 }
 0x2f1   : > { %v465_v61 = vmul.f32 1.442695, %v464_v60 }
 0x2f3   : > { %1307 = vpow2.f32 %v465_v61 }
 0x2f6   : > { %v579_v62 = vpop.xlane.xlu0 %578 }
 0x2f7   : > { %v580_v63 = vsub.f32 %v576_v39, %v579_v62 }
 0x2f9   : > { %v581_v1 = vmul.f32 1.442695, %v580_v63 }
 0x2fb   : > { %1309 = vpow2.f32 %v581_v1 }
 0x2fe   : > { %v695_v2 = vpop.xlane.xlu0 %694 }
 0x2ff   : > { %v696_v3 = vsub.f32 %v692_v47, %v695_v2 }
 0x300   : > { %v1308_v4 = vpop.eup %1307 }
 0x301   : > { %v697_v5 = vmul.f32 1.442695, %v696_v3  ;;  %v467_v6 = vsel %vm411_vm2, %v1308_v4, 0.0 }
 0x302   : > { %468 = vadd.xlane.f32.xlu0 %v467_v6 }
 0x303   : > { %1311 = vpow2.f32 %v697_v5 }
 0x306   : > { %v811_v11 = vpop.xlane.xlu1 %810 }
 0x307   : > { %v812_v12 = vsub.f32 %v808_v55, %v811_v11 }
 0x308   : > { %v1310_v7 = vpop.eup %1309 }
 0x309   : > { %v583_v8 = vsel %vm411_vm2, %v1310_v7, 0.0  ;;  %v813_v14 = vmul.f32 1.442695, %v812_v12 }
 0x30a   : > { %584 = vadd.xlane.f32.xlu1 %v583_v8 }
 0x30b   : > { %1313 = vpow2.f32 %v813_v14 }
 0x310   : > { %v1312_v9 = vpop.eup %1311 }
 0x311   : > { %v699_v10 = vsel %vm411_vm2, %v1312_v9, 0.0 }
 0x312   : > { %700 = vadd.xlane.f32.xlu0 %v699_v10 }
 0x318   : > { %v1314_v15 = vpop.eup %1313 }
 0x319   : > { %v815_v16 = vsel %vm411_vm2, %v1314_v15, 0.0 }
 0x31b   : > { %591 = vrot.lane.b32.xlu1 %v1737_v13, %s1539_s10  ;;  %s1545_s10 = smov [#allocation9]  }
 0x328   : > { %474 = vrot.lane.b32.xlu0 %v1737_v13, %s1540_s17  ;;  %s1409_s17 = sshll.u32 %s1545_s10, 4  ;;  %s1410_s17 = int_to_ptr.vmem [resolvable:$false] %s1409_s17 }
 0x329   : > { %p1412_p8 = scmp.lt.s32.totalorder %s1817_s6, %s1410_s17 }
 0x32c   : > { %823 = vrot.lane.b32.xlu0 %v1737_v13, %s1541_s25  ;;  %s1411_s25 = scalar_lea.vmem %s1410_s17, 1024 }
 0x32d   : > { %p1413_p1 = scmp.lt.s32.totalorder %s1411_s25, %s1405_s16 }
 0x32f   : > { %p1414_p4 = por %p1413_p1, %p1412_p8 }
 0x331   : > { %p1415_p9 = pnand %p1414_p4, %p1408_p2 }
 0x33f   : > { %816 = vadd.xlane.f32.xlu1 %v815_v16 }
 0x350   : > { %707 = vrot.lane.b32.xlu1 %v1737_v13, %s1542_s13 }
 0x38b   : > { %v469_v17 = vpop.xlane.xlu0 %468 }
 0x38c   : > { %1315 = vrcp.f32 %v469_v17 }
 0x393   : > { %v585_v18 = vpop.xlane.xlu1 %584 }
 0x394   : > { %1317 = vrcp.f32 %v585_v18 }
 0x397   : > { %v592_v24 = vpop.permute.xlu1 %591 }
 0x398   : > { %v597_v27 = vsel %vm479_vm3, %v592_v24, 0 }
 0x399   : > { %v1316_v19 = vpop.eup %1315 }
 0x39a   : > { %v471_v20 = vmul.f32 %v1316_v19, %v1308_v4 }
 0x39b   : > { %v701_v21 = vpop.xlane.xlu0 %700 }
 0x39c   : > { %1319 = vrcp.f32 %v701_v21  ;;  %472 = vst.msk [vmem:[%s1782_s29] sm:$0xff] %vm411_vm2, %v471_v20  ;;  %v473_v25 = vpack.c.bf16 %v471_v20, %v471_v20 }
 0x39f   : > { %v475_v22 = vpop.permute.xlu0 %474 }
 0x3a0   : > { %v481_v23 = vsel %vm479_vm3, %v475_v22, 0 }
 0x3a1   : > { %v1318_v13 = vpop.eup %1317  ;;  %1164 = vmatpush3.bf16.msra.mxu0 %v481_v23 }
 0x3a2   : > { %1175 = vmatprep.subr.bf16.mxu0 %v1530_v0  ;;  %v587_v26 = vmul.f32 %v1318_v13, %v1310_v7 }
 0x3a3   : > { %v824_v34 = vpop.permute.xlu0 %823 }
 0x3a4   : > { %1166 = vmatmul.mubr.msk.bf16.vlgmr.msra.gmra.mxu0 %vm411_vm2, %v473_v25  ;;  %1111 = vst.msk [vmem:[%s1782_s29 + $0x8] sm:$0xff] %vm411_vm2, %v587_v26  ;;  %v590_v29 = vpack.c.bf16 %v587_v26, %v587_v26  ;;  %v829_v36 = vsel %vm479_vm3, %v824_v34, 0 }
 0x3a5   : > { %1176 = vmatpush3.bf16.msra.mxu0 %v597_v27  ;;  %1177 = vmatprep.mubr.msk.bf16.mxu0 %vm1531_vm0, %v1530_v0 }
 0x3a6   : > { %1187 = vmatprep.subr.bf16.mxu0 %v1530_v0 }
 0x3a9   : > { %v1320_v28 = vpop.eup %1319 }
 0x3aa   : > { %v703_v30 = vmul.f32 %v1320_v28, %v1312_v9 }
 0x3ac   : > { %1178 = vmatmul.mubr.msk.bf16.vlgmr.msra.gmra.mxu0 %vm411_vm2, %v590_v29  ;;  %1115 = vst.msk [vmem:[%s1782_s29 + $0x10] sm:$0xff] %vm411_vm2, %v703_v30  ;;  %v706_v35 = vpack.c.bf16 %v703_v30, %v703_v30 }
 0x3ad   : > { %1189 = vmatprep.mubr.msk.bf16.mxu0 %vm1531_vm0, %v1530_v0 }
 0x3c8   : > { %v817_v31 = vpop.xlane.xlu1 %816 }
 0x3c9   : > { %1321 = vrcp.f32 %v817_v31 }
 0x3cc   : > { %v708_v32 = vpop.permute.xlu1 %707 }
 0x3cd   : > { %v713_v33 = vsel %vm479_vm3, %v708_v32, 0 }
 0x3ce   : > { %1188 = vmatpush3.bf16.msra.mxu0 %v713_v33 }
 0x3cf   : > { %1199 = vmatprep.subr.bf16.mxu0 %v1530_v0 }
 0x3d1   : > { %1190 = vmatmul.mubr.msk.bf16.vlgmr.msra.gmra.mxu0 %vm411_vm2, %v706_v35 }
 0x3d2   : > { %1200 = vmatpush3.bf16.msra.mxu0 %v829_v36  ;;  %1201 = vmatprep.mubr.msk.bf16.mxu0 %vm1531_vm0, %v1530_v0 }
 0x3d6   : > { %v1322_v37 = vpop.eup %1321 }
 0x3d7   : > { %v819_v38 = vmul.f32 %v1322_v37, %v1314_v15 }
 0x3d9   : > { %1119 = vst.msk [vmem:[%s1782_s29 + $0x18] sm:$0xff] %vm411_vm2, %v819_v38  ;;  %v822_v39 = vpack.c.bf16 %v819_v38, %v819_v38 }
 0x3db   : > { %1202 = vmatmul.mubr.msk.bf16.vlgmr.msra.gmra.mxu0 %vm411_vm2, %v822_v39 }
 0x464   : > { %v517_v40 = vpop.f32.mrf.mxu0 }
 0x466   : > { %v1167_v41 = vpop.f32.mrf.mxu0 }
 0x468   : > { %v520_v42 = vpop.f32.mrf.mxu0 }
 0x46a   : > { %v1168_v43 = vpop.f32.mrf.mxu0 }
 0x46c   : > { %v633_v44 = vpop.f32.mrf.mxu0 }
 0x46d   : > { %872 = vrot.lane.b32.xlu1 %v633_v44, %s1543_s11 }
 0x46e   : > { %v1179_v0 = vpop.f32.mrf.mxu0 }
 0x470   : > { %v636_v45 = vpop.f32.mrf.mxu0 }
 0x472   : > { %v1180_v46 = vpop.f32.mrf.mxu0 }
 0x491   : > { %v749_v47 = vpop.f32.mrf.mxu0 }
 0x492   : > { %876 = vrot.lane.b32.xlu0 %v749_v47, %s1544_s7 }
 0x493   : > { %v1191_v48 = vpop.f32.mrf.mxu0 }
 0x495   : > { %v752_v49 = vpop.f32.mrf.mxu0 }
 0x496   : > { %1418 = shalt.err (!%p1415_p9)
}
 0x497   : > { %s1419_s13 = scalar_lea.hbm %s1815_s15, 512  ;;  %s1423_s27 = scalar_lea.hbm %s1898_s5, 1024 }
 0x498   : > { %p1420_p6 = scmp.ne.s32.totalorder %s1815_s15, %s1419_s13  ;;  %p1424_p0 = scmp.lt.s32.totalorder %s1815_s15, %s1898_s5 }
 0x499   : > { %p1425_p3 = scmp.lt.s32.totalorder %s1423_s27, %s1419_s13 }
 0x49a   : > { %p1421_p5 = pnand %p1420_p6, %p1911_p12 }
 0x49b   : > { %p1426_p7 = por %p1425_p3, %p1424_p0 }
 0x49c   : > { %p1422_p11 = pneg %p1421_p5 }
 0x49e   : > { %p1427_p10 = pnand %p1426_p7, %p1422_p11 }
 0x4a0   : > { %1430 = shalt.err (!%p1427_p10)
}
 0x4a1   : > { %s1546_s16 = smov 128   ;;  %v1192_v50 = vpop.f32.mrf.mxu0  ;;  %s1547_s10 = smov 24   ;;  %vm884_vm4 = vcmask 130048   ;;  %vm886_vm5 = vcmask 195584  }
 0x4a2   : > { %1214 = dma.vmem_to_hbm [thread:$0]  (%p1911_p12), %s1817_s6, 512, %s1815_s15, %s895_s0, %s1546_s16, %s1546_s16, %s1543_s11  }
 0x4a3   : > { %v865_v51 = vpop.f32.mrf.mxu0  ;;  %s1123_s17 = sshll.u32 %s1515_s21, 7  ;;  %s334_s25 = scalar_lea.vmem [#allocation8], %s1100_s28 }
 0x4a4   : > { %880 = vrot.lane.b32.xlu1 %v865_v51, %s1547_s10  ;;  %s909_s13 = sshll.u32 %s334_s25, 4  ;;  %s1850_s15 = scalar_lea.hbm %s1897_s4, %s1123_s17  ;;  %s910_s13 = int_to_ptr.vmem [resolvable:$true] %s909_s13 }
 0x4a5   : > { %v1203_v52 = vpop.f32.mrf.mxu0  ;;  %s890_s0 = scalar_lea.sflag [#allocation4], %s1701_s14  ;;  %s1431_s29 = scalar_lea.vmem %s910_s13, 128 }
 0x4a6   : > { %p1432_p13 = scmp.ne.s32.totalorder %s910_s13, %s1431_s29  ;;  %s1548_s21 = smov [#allocation8]  }
 0x4a7   : > { %v868_v53 = vpop.f32.mrf.mxu0  ;;  %s1435_s28 = sshll.u32 %s1548_s21, 4  ;;  %s1436_s28 = int_to_ptr.vmem [resolvable:$false] %s1435_s28 }
 0x4a8   : > { %p1433_p2 = pnand %p1432_p13, %p1911_p12  ;;  %s1437_s7 = scalar_lea.vmem %s1436_s28, 256 }
 0x4a9   : > { %v1204_v54 = vpop.f32.mrf.mxu0  ;;  %p1438_p1 = scmp.lt.s32.totalorder %s910_s13, %s1436_s28  ;;  %p1439_p4 = scmp.lt.s32.totalorder %s1437_s7, %s1431_s29 }
 0x4aa   : > { %p1434_p8 = pneg %p1433_p2 }
 0x4ab   : > { %p1440_p9 = por %p1439_p4, %p1438_p1 }
 0x4ad   : > { %p1441_p6 = pnand %p1440_p9, %p1434_p8 }
 0x4df   : > { %v873_v55 = vpop.permute.xlu1 %872 }
 0x4e0   : > { %v883_v57 = vsel %vm411_vm2, %v517_v40, %v873_v55 }
 0x504   : > { %v877_v56 = vpop.permute.xlu0 %876 }
 0x505   : > { %v885_v58 = vsel %vm884_vm4, %v883_v57, %v877_v56 }
 0x516   : > { %v881_v59 = vpop.permute.xlu1 %880 }
 0x517   : > { %v887_v60 = vsel %vm886_vm5, %v885_v58, %v881_v59 }
 0x518   : > { %888 = vst.msk [vmem:[%s334_s25] sm:$0xff] %vm363_vm1, %v887_v60 }
 0x519   : > { %1444 = shalt.err (!%p1441_p6)
}
 0x51a   : > { %s1445_s27 = scalar_lea.hbm %s1850_s15, 128  ;;  %s1449_s26 = scalar_lea.hbm %s1897_s4, 256 }
 0x51b   : > { %p1446_p5 = scmp.ne.s32.totalorder %s1850_s15, %s1445_s27  ;;  %p1450_p3 = scmp.lt.s32.totalorder %s1850_s15, %s1897_s4 }
 0x51c   : > { %p1451_p7 = scmp.lt.s32.totalorder %s1449_s26, %s1445_s27 }
 0x51d   : > { %p1447_p11 = pnand %p1446_p5, %p1911_p12 }
 0x51e   : > { %p1452_p10 = por %p1451_p7, %p1450_p3 }
 0x51f   : > { %p1448_p0 = pneg %p1447_p11 }
 0x521   : > { %p1453_p13 = pnand %p1452_p10, %p1448_p0 }
 0x523   : > { %1456 = shalt.err (!%p1453_p13)
}
 0x524   : > { %1213 = dma.vmem_to_hbm [thread:$0]  (%p1911_p12), %s910_s13, 128, %s1850_s15, %s890_s0  }
 0x525 PF: > { %s939_s17 = sand.u32 1, %s1503_s18   ;;  %p1912_p2 = scmp.ne.s32.totalorder %s1906_s9, 0 }
 0x526   : > { %p1913_p8 = scmp.ge.s32.totalorder %s1523_s23, 2  ;;  %s940_s25 = scalar_lea.sflag [#allocation4], %s939_s17 }
 0x528   : > { %p1229_p1 = pnand %p1913_p8, %p1912_p2 }
 0x52a   : > { %p1230_p4 = pneg %p1229_p1 }
 0x52c   : > { %1494 = dma.done.wait (%p1230_p4), %s940_s25, 128  }
 0x52d   : > { %1496 = vsyncadd (%p1230_p4), %s940_s25, 4294967168  ;;  %s949_s11 = scalar_lea.sflag [#allocation10], %s939_s17 }
 0x52e   : > { %1498 = dma.done.wait (%p1230_p4), %s949_s11, 512  }
 0x52f   : > { %1500 = vsyncadd (%p1230_p4), %s949_s11, 4294966784  ;;  %s26_s23 = sadd.s32 1, %s1523_s23   ;;  %s1914_s18 = smov %s1507_s19 }
 0x530   : > { %p23_p9 = scmp.ge.s32.totalorder %s26_s23, 4   ;;  %s1915_s19 = smov %s1511_s20 }
 0x531   : > { %s1916_s20 = smov %s1627_s30  ;;  %s1917_s21 = smov %s1519_s22 }
 0x532   : > { %s1918_s22 = smov %s1920_s24  ;;  %25 = sbr.rel (!%p23_p9) target bundleno = 11 (0xb), region = 123 }
 0x537   :  { %954 = vsyncpa [#allocation3], 1 }
 0x538   :  { %956 = vsyncpa [#allocation3 + $0x1], 1 }
 0x539   :  { %957 = vsyncpa [#allocation6], 1 }
 0x53a   :  { %958 = vsyncpa [#allocation4], 1 }
 0x53b   :  { %960 = vsyncpa [#allocation4 + $0x1], 1 }
 0x53c   :  { %961 = vsyncpa [#allocation10], 1 }
 0x53d   :  { %963 = vsyncpa [#allocation10 + $0x1], 1 }

</bundles_post_ra>
